<compile_context>
chip_gen: v7x
topology: tpu7x:2x2x1
jax: 0.10.0
libtpu: 0.0.40
codegen_flags: <defaults>
</compile_context>

<pallas_src>
import functools

import jax
import jax.numpy as jnp
from jax.experimental import pallas as pl
from jax.experimental.pallas import tpu as pltpu

_MiB = 1024 * 1024
_SQRT_HALF = 0.7071067811865476


def _gelu(x, approximate):
    if approximate:
        # tanh-based GELU -> EUP slot, nearly free next to the MXU.
        return jax.nn.gelu(x, approximate=True)
    # Exact erf formulation (bit-parity with nn.GELU() default); VPU polynomial.
    return 0.5 * x * (1.0 + jax.lax.erf(x * jnp.float32(_SQRT_HALF)))


def sentia_mlp_kernel(x_ref, w1_ref, b1_ref, w2_ref, b2_ref, o_ref, acc_ref,
                      *, approximate_gelu):
    k = pl.program_id(1)

    # h_chunk = GELU(x @ W1[:, k-tile] + b1[k-tile])   (f32)
    h = jnp.dot(x_ref[...], w1_ref[...],
                preferred_element_type=jnp.float32) + b1_ref[...]
    h = _gelu(h, approximate_gelu)
    # a_D dropout(p=0.05): identity in eval mode.
    # TODO(synk): train-mode stochastic dropout not implemented (inference semantics).

    prod = jnp.dot(h.astype(w2_ref.dtype), w2_ref[...],
                   preferred_element_type=jnp.float32)

    @pl.when(k == 0)
    def _init():
        # Initialize with the first product: saves a (tm, H) f32 zero-store
        # plus reload per row tile.
        acc_ref[...] = prod

    @pl.when(k > 0)
    def _accumulate():
        acc_ref[...] += prod

    @pl.when(k == pl.num_programs(1) - 1)
    def _finalize():
        # dense_2 bias; l_D dropout(p=0.01) identity in eval mode.
        o_ref[...] = (acc_ref[...] + b2_ref[...]).astype(o_ref.dtype)


def _round_up(a, b):
    return ((a + b - 1) // b) * b


def _tpu_generation_params():
    """Generation-aware VMEM budget and tile defaults."""
    try:
        cap = int(pltpu.get_tpu_info().vmem_capacity_bytes)
    except Exception:
        cap = 64 * _MiB  # conservative (v7x-sized) if the query is unavailable
    if cap >= 100 * _MiB:
        # v5e / v6e: 128 MiB physical VMEM, single TensorCore per chip.
        return dict(vmem_cap=cap, budget=96 * _MiB, tm_default=768,
                    tm_floor=256, two_cores=False)
    # v7x-sized (64 MiB per TC) or unknown: stay well inside the limit and
    # prefer feeding both TensorCores.
    return dict(vmem_cap=cap, budget=46 * _MiB, tm_default=640,
                tm_floor=256, two_cores=True)


def _pick_tk(h4, tk_req):
    """Largest multiple-of-128 divisor of h4 that is <= tk_req (with fallbacks)."""
    if h4 % tk_req == 0:
        return tk_req
    best_le, smallest = None, None
    d = 128
    while d <= h4:
        if h4 % d == 0:
            if smallest is None:
                smallest = d
            if d <= tk_req:
                best_le = d
        d += 128
    if best_le is not None:
        return best_le
    if smallest is not None:
        return smallest
    # TODO(synk): H4 not a multiple of 128 -- fall back to the full extent.
    return h4


def sentia_mlp(x, w1, b1, w2, b2, *, tm=None, tk=None,
               compute_dtype=jnp.bfloat16, approximate_gelu=True,
               vmem_budget_bytes=None):
    """SENTIAMLP forward (eval). x: (..., H); w1:(H,4H) b1:(4H,) w2:(4H,H) b2:(H,)."""
    orig_shape = x.shape
    H = orig_shape[-1]
    x2d = x.reshape(-1, H)
    M = x2d.shape[0]
    H4 = w1.shape[1]
    assert w1.shape == (H, H4) and w2.shape == (H4, H)
    assert b1.shape == (H4,) and b2.shape == (H,)
    out_dtype = x.dtype

    gen = _tpu_generation_params()
    budget = vmem_budget_bytes if vmem_budget_bytes is not None else gen["budget"]

    c_bytes = jnp.dtype(compute_dtype).itemsize
    out_bytes = jnp.dtype(out_dtype).itemsize
    # bf16 packs 2 rows/sublane (int8 packs 4) -> row tiles multiples of 16/32.
    row_align = {1: 32, 2: 16}.get(c_bytes, 8)

    # ---- tile selection ----
    tm_user = tm is not None
    if tm is None:
        tm = gen["tm_default"]                    # above weight-streaming ridge
    tm = _round_up(tm, row_align)
    tm = min(tm, _round_up(M, row_align))         # don't over-tile tiny problems
    tm_floor = min(gen["tm_floor"], tm)

    if tk is None:
        tk = 512
    tk = _pick_tk(H4, tk)

    def vmem_bytes(tm_, tk_):
        xb = 2 * tm_ * H * c_bytes          # x row tile (double-buffered)
        w1b = 2 * H * tk_ * c_bytes         # W1 k-tile (double-buffered)
        w2b = 2 * tk_ * H * c_bytes         # W2 k-tile (double-buffered)
        bb = 2 * (tk_ + H) * 4              # b1 k-tile + b2 (f32)
        acc = tm_ * H * 4                   # f32 accumulator scratch
        ob = 2 * tm_ * H * out_bytes        # output tile (real out dtype)
        return xb + w1b + w2b + bb + acc + ob

    # Shrink policy: tm down to the ridge floor first, then tk down to 256,
    # then tm/tk further only as a last resort (keeps the MXU contraction wide).
    while vmem_bytes(tm, tk) > budget and tm > tm_floor:
        tm = max(tm_floor, _round_up(tm // 2, row_align))
    while (vmem_bytes(tm, tk) > budget and tk > 256
           and tk % 2 == 0 and H4 % (tk // 2) == 0):
        tk //= 2
    while vmem_bytes(tm, tk) > budget and tm > row_align:
        tm = max(row_align, _round_up(tm // 2, row_align))
    while (vmem_bytes(tm, tk) > budget and tk > 128
           and tk % 2 == 0 and H4 % (tk // 2) == 0):
        tk //= 2

    # On 2-TC parts, prefer >= 2 row tiles on the "parallel" axis when M allows.
    if (not tm_user and gen["two_cores"] and pl.cdiv(M, tm) < 2
            and M > 2 * row_align):
        tm = max(row_align, _round_up(pl.cdiv(M, 2), row_align))

    # Partial edge row block is masked by Pallas -- no host-side pad / slice.
    grid = (pl.cdiv(M, tm), H4 // tk)

    # ---- cast to compute dtype (bf16 weights/activations, f32 biases) ----
    x_c = x2d.astype(compute_dtype)
    w1_c = w1.astype(compute_dtype)
    w2_c = w2.astype(compute_dtype)
    b1_2d = b1.reshape(1, H4).astype(jnp.float32)
    b2_2d = b2.reshape(1, H).astype(jnp.float32)

    cost = pl.CostEstimate(
        flops=int(4 * M * H * H4),                    # two matmuls
        transcendentals=int(M * H4),                  # GELU
        bytes_accessed=int(
            x_c.size * c_bytes + M * H * out_bytes
            # W1/W2/biases are re-streamed once per row tile:
            + grid[0] * (w1_c.size * c_bytes + w2_c.size * c_bytes
                         + b1_2d.size * 4 + b2_2d.size * 4)),
    )

    vmem_limit = int(min(gen["vmem_cap"],
                         max(32 * _MiB, int(1.25 * vmem_bytes(tm, tk)))))

    kernel = functools.partial(sentia_mlp_kernel,
                               approximate_gelu=approximate_gelu)

    out = pl.pallas_call(
        kernel,
        out_shape=jax.ShapeDtypeStruct((M, H), out_dtype),
        grid_spec=pltpu.PrefetchScalarGridSpec(
            num_scalar_prefetch=0,
            grid=grid,
            in_specs=[
                pl.BlockSpec((tm, H), lambda i, k: (i, 0)),    # x row tile
                pl.BlockSpec((H, tk), lambda i, k: (0, k)),    # W1 k-tile
                pl.BlockSpec((1, tk), lambda i, k: (0, k)),    # b1 k-tile
                pl.BlockSpec((tk, H), lambda i, k: (k, 0)),    # W2 k-tile
                pl.BlockSpec((1, H), lambda i, k: (0, 0)),     # b2
            ],
            out_specs=pl.BlockSpec((tm, H), lambda i, k: (i, 0)),
            scratch_shapes=[pltpu.VMEM((tm, H), jnp.float32)],
        ),
        compiler_params=pltpu.CompilerParams(
            dimension_semantics=("parallel", "arbitrary"),
            vmem_limit_bytes=vmem_limit),
        cost_estimate=cost,
    )(x_c, w1_c, b1_2d, w2_c, b2_2d)

    return out.reshape(orig_shape)


# ------------------------- reference & test harness -------------------------

def _ref_mlp(x2d, w1, b1, w2, b2, *, approximate):
    h = _gelu(x2d @ w1 + b1, approximate)
    return h @ w2 + b2


def _make_params(key, H):
    H4 = 4 * H
    kw1, kb1, kw2, kb2 = jax.random.split(key, 4)
    bound1 = 1.0 / (H ** 0.5)
    w1 = jax.random.uniform(kw1, (H, H4), jnp.float32, -bound1, bound1)
    b1 = jax.random.uniform(kb1, (H4,), jnp.float32, -bound1, bound1)
    bound2 = 1.0 / (H4 ** 0.5)
    w2 = jax.random.uniform(kw2, (H4, H), jnp.float32, -bound2, bound2)
    b2 = jax.random.uniform(kb2, (H,), jnp.float32, -bound2, bound2)
    return w1, b1, w2, b2


if __name__ == "__main__":
    key = jax.random.PRNGKey(0)
    k1, k2, k3, kp1, kp2 = jax.random.split(key, 5)

    # --- Test 1: small module shape (batch=2, seq=8, hidden=32), f32 compute
    #     + exact-erf GELU for tight parity with the PyTorch forward. ---
    B1, S1, H1 = 2, 8, 32
    x1 = jax.random.normal(k1, (B1, S1, H1), dtype=jnp.float32)
    w1a, b1a, w2a, b2a = _make_params(kp1, H1)
    y1 = jax.block_until_ready(
        sentia_mlp(x1, w1a, b1a, w2a, b2a,
                   compute_dtype=jnp.float32, approximate_gelu=False))
    ref1 = _ref_mlp(x1.reshape(-1, H1), w1a, b1a, w2a, b2a, approximate=False)
    assert jnp.allclose(y1.reshape(-1, H1), ref1, atol=1e-5, rtol=1e-5), \
        "f32 exact-GELU path mismatch"

    # --- Test 2: hidden=128, ragged token count (M=26) with explicit small
    #     tiles: exercises the masked partial edge row block, k-accumulation
    #     (grid = (2, 4)) and the default bf16 + tanh-GELU path. ---
    B2, S2, H2 = 2, 13, 128
    x2 = jax.random.normal(k2, (B2, S2, H2), dtype=jnp.float32)
    w1b, b1b, w2b, b2b = _make_params(kp2, H2)
    y2 = jax.block_until_ready(sentia_mlp(x2, w1b, b1b, w2b, b2b, tm=16, tk=128))
    ref2 = _ref_mlp(x2.reshape(-1, H2), w1b, b1b, w2b, b2b, approximate=True)
    err2 = float(jnp.max(jnp.abs(y2.reshape(-1, H2) - ref2)))
    assert err2 < 5e-2, f"bf16 ragged path max abs err too large: {err2}"

    # --- Test 3: default (generation-aware) tile selection path, aligned M. ---
    B3, S3, H3 = 4, 16, 128
    x3 = jax.random.normal(k3, (B3, S3, H3), dtype=jnp.float32)
    y3 = jax.block_until_ready(sentia_mlp(x3, w1b, b1b, w2b, b2b))
    ref3 = _ref_mlp(x3.reshape(-1, H3), w1b, b1b, w2b, b2b, approximate=True)
    err3 = float(jnp.max(jnp.abs(y3.reshape(-1, H3) - ref3)))
    assert err3 < 5e-2, f"default-tile path max abs err too large: {err3}"

    print("KERNEL_OK")
</pallas_src>

<mosaic_0001>
module attributes {stable_mosaic.version = 11 : i64} {
  func.func @sentia_mlp_kernel(%arg0: i32, %arg1: i32, %arg2: memref<16x32xf32, #tpu.memory_space<vmem>>, %arg3: memref<32x128xf32, #tpu.memory_space<vmem>>, %arg4: memref<1x128xf32, #tpu.memory_space<vmem>>, %arg5: memref<128x32xf32, #tpu.memory_space<vmem>>, %arg6: memref<1x32xf32, #tpu.memory_space<vmem>>, %arg7: memref<16x32xf32, #tpu.memory_space<vmem>>, %arg8: memref<16x32xf32, #tpu.memory_space<vmem>>) attributes {dimension_semantics = [#tpu.dimension_semantics<parallel>, #tpu.dimension_semantics<arbitrary>], iteration_bounds = array<i64: 1, 1>, scalar_prefetch = 0 : i64, scratch_operands = 1 : i64, tpu.core_type = #tpu.core_type<tc>, window_params = [{transform_indices = @transform_0, window_bounds = array<i64: 16, 32>}, {transform_indices = @transform_1, window_bounds = array<i64: 32, 128>}, {transform_indices = @transform_2, window_bounds = array<i64: 1, 128>}, {transform_indices = @transform_3, window_bounds = array<i64: 128, 32>}, {pipeline_mode = #tpu.pipeline_mode<synchronous>, transform_indices = @transform_4, window_bounds = array<i64: 1, 32>}, {transform_indices = @transform_5, window_bounds = array<i64: 16, 32>}]} {
    %c0 = arith.constant 0 : index
    %c0_0 = arith.constant 0 : index
    %0 = vector.load %arg2[%c0, %c0_0] : memref<16x32xf32, #tpu.memory_space<vmem>>, vector<16x32xf32>
    %c0_1 = arith.constant 0 : index
    %c0_2 = arith.constant 0 : index
    %1 = vector.load %arg3[%c0_1, %c0_2] : memref<32x128xf32, #tpu.memory_space<vmem>>, vector<32x128xf32>
    %cst = arith.constant dense<0.000000e+00> : vector<16x128xf32>
    %2 = tpu.matmul %0, %1, %cst {dimension_numbers = #tpu.dot_dimension_numbers<[1], [0], [0], [1], [0, 0, 1, 1], [], []>} : vector<16x32xf32>, vector<32x128xf32>, vector<16x128xf32> -> vector<16x128xf32>
    %c0_3 = arith.constant 0 : index
    %c0_4 = arith.constant 0 : index
    %3 = vector.load %arg4[%c0_3, %c0_4] : memref<1x128xf32, #tpu.memory_space<vmem>>, vector<1x128xf32>
    %4 = vector.broadcast %3 : vector<1x128xf32> to vector<16x128xf32>
    %5 = arith.addf %2, %4 : vector<16x128xf32>
    %cst_5 = arith.constant 5.000000e-01 : f32
    %6 = vector.broadcast %cst_5 : f32 to vector<16x128xf32>
    %7 = arith.mulf %6, %5 : vector<16x128xf32>
    %cst_6 = arith.constant 0.707106769 : f32
    %8 = vector.broadcast %cst_6 : f32 to vector<16x128xf32>
    %9 = arith.mulf %5, %8 : vector<16x128xf32>
    %10 = math.erf %9 : vector<16x128xf32>
    %cst_7 = arith.constant 1.000000e+00 : f32
    %11 = vector.broadcast %cst_7 : f32 to vector<16x128xf32>
    %12 = arith.addf %11, %10 : vector<16x128xf32>
    %13 = arith.mulf %7, %12 : vector<16x128xf32>
    %c0_8 = arith.constant 0 : index
    %c0_9 = arith.constant 0 : index
    %14 = vector.load %arg5[%c0_8, %c0_9] : memref<128x32xf32, #tpu.memory_space<vmem>>, vector<128x32xf32>
    %cst_10 = arith.constant dense<0.000000e+00> : vector<16x32xf32>
    %15 = tpu.matmul %13, %14, %cst_10 {dimension_numbers = #tpu.dot_dimension_numbers<[1], [0], [0], [1], [0, 0, 1, 1], [], []>} : vector<16x128xf32>, vector<128x32xf32>, vector<16x32xf32> -> vector<16x32xf32>
    %c0_i32 = arith.constant 0 : i32
    %16 = arith.cmpi eq, %arg1, %c0_i32 : i32
    %17 = arith.extui %16 : i1 to i32
    %c0_i32_11 = arith.constant 0 : i32
    %18 = arith.cmpi ne, %17, %c0_i32_11 : i32
    scf.if %18 {
      %c0_16 = arith.constant 0 : index
      %c0_17 = arith.constant 0 : index
      %25 = vector.load %arg8[%c0_16, %c0_17] : memref<16x32xf32, #tpu.memory_space<vmem>>, vector<16x32xf32>
      tpu.vector_store %arg8[%c0_16, %c0_17], %15 {strides = array<i32>} : memref<16x32xf32, #tpu.memory_space<vmem>>, vector<16x32xf32>,
    } else {
    }
    %c0_i32_12 = arith.constant 0 : i32
    %19 = arith.cmpi sgt, %arg1, %c0_i32_12 : i32
    %20 = arith.extui %19 : i1 to i32
    %c0_i32_13 = arith.constant 0 : i32
    %21 = arith.cmpi ne, %20, %c0_i32_13 : i32
    scf.if %21 {
      %c0_16 = arith.constant 0 : index
      %c0_17 = arith.constant 0 : index
      %25 = vector.load %arg8[%c0_16, %c0_17] : memref<16x32xf32, #tpu.memory_space<vmem>>, vector<16x32xf32>
      %26 = arith.addf %25, %15 : vector<16x32xf32>
      %c0_18 = arith.constant 0 : index
      %c0_19 = arith.constant 0 : index
      %27 = vector.load %arg8[%c0_18, %c0_19] : memref<16x32xf32, #tpu.memory_space<vmem>>, vector<16x32xf32>
      tpu.vector_store %arg8[%c0_18, %c0_19], %26 {strides = array<i32>} : memref<16x32xf32, #tpu.memory_space<vmem>>, vector<16x32xf32>,
    } else {
    }
    %c0_i32_14 = arith.constant 0 : i32
    %22 = arith.cmpi eq, %arg1, %c0_i32_14 : i32
    %23 = arith.extui %22 : i1 to i32
    %c0_i32_15 = arith.constant 0 : i32
    %24 = arith.cmpi ne, %23, %c0_i32_15 : i32
    scf.if %24 {
      %c0_16 = arith.constant 0 : index
      %c0_17 = arith.constant 0 : index
      %25 = vector.load %arg8[%c0_16, %c0_17] : memref<16x32xf32, #tpu.memory_space<vmem>>, vector<16x32xf32>
      %c0_18 = arith.constant 0 : index
      %c0_19 = arith.constant 0 : index
      %26 = vector.load %arg6[%c0_18, %c0_19] : memref<1x32xf32, #tpu.memory_space<vmem>>, vector<1x32xf32>
      %27 = vector.broadcast %26 : vector<1x32xf32> to vector<16x32xf32>
      %28 = arith.addf %25, %27 : vector<16x32xf32>
      %c0_20 = arith.constant 0 : index
      %c0_21 = arith.constant 0 : index
      %29 = vector.load %arg7[%c0_20, %c0_21] : memref<16x32xf32, #tpu.memory_space<vmem>>, vector<16x32xf32>
      tpu.vector_store %arg7[%c0_20, %c0_21], %28 {strides = array<i32>} : memref<16x32xf32, #tpu.memory_space<vmem>>, vector<16x32xf32>,
    } else {
    }
    return
  }
  func.func @transform_0(%arg0: i32, %arg1: i32) -> (i32, i32) {
    %c0_i32 = arith.constant 0 : i32
    %c0_i32_0 = arith.constant 0 : i32
    return %arg0, %c0_i32 : i32, i32
  }
  func.func @transform_1(%arg0: i32, %arg1: i32) -> (i32, i32) {
    %c0_i32 = arith.constant 0 : i32
    %c0_i32_0 = arith.constant 0 : i32
    return %c0_i32, %arg1 : i32, i32
  }
  func.func @transform_2(%arg0: i32, %arg1: i32) -> (i32, i32) {
    %c0_i32 = arith.constant 0 : i32
    %c0_i32_0 = arith.constant 0 : i32
    return %c0_i32, %arg1 : i32, i32
  }
  func.func @transform_3(%arg0: i32, %arg1: i32) -> (i32, i32) {
    %c0_i32 = arith.constant 0 : i32
    %c0_i32_0 = arith.constant 0 : i32
    return %arg1, %c0_i32 : i32, i32
  }
  func.func @transform_4(%arg0: i32, %arg1: i32) -> (i32, i32) {
    %c0_i32 = arith.constant 0 : i32
    %c0_i32_0 = arith.constant 0 : i32
    %c0_i32_1 = arith.constant 0 : i32
    return %c0_i32, %c0_i32_0 : i32, i32
  }
  func.func @transform_5(%arg0: i32, %arg1: i32) -> (i32, i32) {
    %c0_i32 = arith.constant 0 : i32
    %c0_i32_0 = arith.constant 0 : i32
    return %arg0, %c0_i32 : i32, i32
  }
}

</mosaic_0001>

<bundles_post_ra>
// kernel: tpu_custom_call.1
= control target key start
LH: loop header
LB: loop body
LE: loop exit
PB: predicated region body
PF: predicated region fallthrough
CT: control target
= control target key end

     0   :  { %vm34_vm0 = vcmask 261120   ;;  %s533_s0 = inlined_call_operand.vmem [shape: f32[16,32], index: 0, kind: input, shape index: {}]   ;;  %s534_s1 = inlined_call_operand.vmem [shape: f32[32,128], index: 1, kind: input, shape index: {}]   ;;  %s535_s2 = inlined_call_operand.vmem [shape: f32[1,128], index: 2, kind: input, shape index: {}]   ;;  %s536_s3 = inlined_call_operand.vmem [shape: f32[128,32], index: 3, kind: input, shape index: {}]   ;;  %s537_s4 = inlined_call_operand.vmem [shape: f32[1,32], index: 4, kind: input, shape index: {}]   ;;  %s538_s5 = inlined_call_operand.hbm [shape: f32[16,32], index: 5, kind: output, shape index: {}]  }
   0x1   :  { %v23_v0 = vld [vmem:[%s534_s1] sm:$0xff]  ;;  %v24_v1 = vld [vmem:[%s534_s1 + $0x8] sm:$0xff]  ;;  %v25_v2 = vld [vmem:[%s534_s1 + $0x10] sm:$0xff] }
   0x2   :  { %v339_v3 = vpack.c.bf16 %v24_v1, %v23_v0  ;;  %v26_v4 = vld [vmem:[%s534_s1 + $0x18] sm:$0xff]  ;;  %v21_v5 = vld [vmem:[%s533_s0] sm:$0xff]  ;;  %v127_v8 = vld [vmem:[%s536_s3 + $0x8] sm:$0xff] }
   0x3   :  { %v343_v6 = vpack.c.bf16 %v26_v4, %v25_v2  ;;  %301 = vmatprep.mubr.msk.f32.mxu0 %vm34_vm0, %v21_v5  ;;  %v126_v7 = vld [vmem:[%s536_s3] sm:$0xff]  ;;  %v128_v9 = vld [vmem:[%s536_s3 + $0x10] sm:$0xff]  ;;  %v129_v11 = vld [vmem:[%s536_s3 + $0x18] sm:$0xff] }
   0x4   :  { %340 = vmatprep.subr.bf16.mxu0 %v339_v3  ;;  %v347_v10 = vpack.c.bf16 %v127_v8, %v126_v7  ;;  %v351_v12 = vpack.c.bf16 %v129_v11, %v128_v9  ;;  %v130_v13 = vld [vmem:[%s536_s3 + $0x20] sm:$0xff]  ;;  %v131_v14 = vld [vmem:[%s536_s3 + $0x28] sm:$0xff] }
   0x5   :  { %342 = vmatpush3.bf16.msra.mxu0 %v339_v3 }
   0x6   :  { %10 = vsyncpa [#allocation4], 0  ;;  %344 = vmatprep.subr.bf16.mxu0 %v343_v6  ;;  %348 = vmatprep.subr.bf16.mxu1 %v347_v10  ;;  %v355_v15 = vpack.c.bf16 %v131_v14, %v130_v13  ;;  %v22_v16 = vld [vmem:[%s533_s0 + $0x8] sm:$0xff]  ;;  %v132_v17 = vld [vmem:[%s536_s3 + $0x30] sm:$0xff]  ;;  %s410_s11 = smov [#allocation3]  }
   0x7   :  { %350 = vmatpush3.bf16.msra.mxu1 %v347_v10  ;;  %v133_v18 = vld [vmem:[%s536_s3 + $0x38] sm:$0xff]  ;;  %v134_v20 = vld [vmem:[%s536_s3 + $0x40] sm:$0xff]  ;;  %v135_v21 = vld [vmem:[%s536_s3 + $0x48] sm:$0xff]  ;;  %s254_s12 = sshll.u32 %s410_s11, 4  ;;  %s255_s12 = int_to_ptr.vmem [resolvable:$true] %s254_s12 }
   0x8   :  { %352 = vmatprep.subr.bf16.mxu1 %v351_v12  ;;  %v359_v19 = vpack.c.bf16 %v133_v18, %v132_v17  ;;  %v363_v22 = vpack.c.bf16 %v135_v21, %v134_v20  ;;  %v136_v23 = vld [vmem:[%s536_s3 + $0x50] sm:$0xff]  ;;  %v137_v24 = vld [vmem:[%s536_s3 + $0x58] sm:$0xff]  ;;  %v138_v26 = vld [vmem:[%s536_s3 + $0x60] sm:$0xff]  ;;  %s386_s13 = scalar_lea.vmem %s255_s12, 256  ;;  %p391_p1 = scmp.lt.s32.totalorder %s255_s12, %s255_s12 }
   0x9   :  { %346 = vmatpush3.bf16.msra.mxu0 %v343_v6  ;;  %v367_v25 = vpack.c.bf16 %v137_v24, %v136_v23  ;;  %v139_v27 = vld [vmem:[%s536_s3 + $0x68] sm:$0xff]  ;;  %v140_v29 = vld [vmem:[%s536_s3 + $0x70] sm:$0xff]  ;;  %v141_v30 = vld [vmem:[%s536_s3 + $0x78] sm:$0xff]  ;;  %p387_p0 = scmp.ne.s32.totalorder %s255_s12, %s386_s13  ;;  %p392_p2 = scmp.lt.s32.totalorder %s386_s13, %s386_s13 }
   0xa   :  { %v371_v28 = vpack.c.bf16 %v139_v27, %v138_v26  ;;  %v375_v31 = vpack.c.bf16 %v141_v30, %v140_v29  ;;  %v265_v32 = vld [vmem:[%s535_s2] ss:$0 sm:$0xff] }
   0xb   :  { %354 = vmatpush3.bf16.msra.mxu1 %v351_v12  ;;  %v268_v49 = vld [vmem:[%s537_s4] ss:$0 sm:$0xff]  ;;  %p393_p3 = por %p392_p2, %p391_p1 }
   0xc   :  { %302 = vmatmul.mubr.msk.f32.vlgmr.msra.gmra.mrb[0].mxu0 %vm34_vm0, %v22_v16  ;;  %356 = vmatprep.subr.bf16.mxu1 %v355_v15 }
   0xd   :  { %p394_p4 = pnand %p393_p3, %p387_p0 }
   0xf   :  { %358 = vmatpush3.bf16.msra.mxu1 %v355_v15 }
  0x10   :  { %360 = vmatprep.subr.bf16.mxu1 %v359_v19 }
  0x13   :  { %362 = vmatpush3.bf16.msra.mxu1 %v359_v19 }
  0x14   :  { %364 = vmatprep.subr.bf16.mxu1 %v363_v22 }
  0x17   :  { %366 = vmatpush3.bf16.msra.mxu1 %v363_v22 }
  0x18   :  { %368 = vmatprep.subr.bf16.mxu1 %v367_v25 }
  0x1b   :  { %370 = vmatpush3.bf16.msra.mxu1 %v367_v25 }
  0x1c   :  { %372 = vmatprep.subr.bf16.mxu1 %v371_v28 }
  0x1f   :  { %374 = vmatpush3.bf16.msra.mxu1 %v371_v28 }
  0x20   :  { %376 = vmatprep.subr.bf16.mxu1 %v375_v31 }
  0x23   :  { %378 = vmatpush3.bf16.msra.mxu1 %v375_v31 }
  0xdf   :  { %v303_v33 = vpop.f32.mrb[0].mxu0 }
  0xe0   :  { %v113_v34 = vadd.f32 %v303_v33, %v265_v32  ;;  %v107_v35 = vpop.f32.mrb[1].mxu0 }
  0xe1   :  { %v108_v36 = vadd.f32 %v265_v32, %v107_v35 }
  0xe2   :  { %v119_v37 = vmul.f32 0.70710677, %v113_v34  ;;  %v117_v44 = vmul.f32 0.5, %v113_v34 }
  0xe3   :  { %v118_v38 = vmul.f32 0.70710677, %v108_v36  ;;  %v116_v42 = vmul.f32 0.5, %v108_v36 }
  0xe4   :  { %382 = verf.f32 %v119_v37 }
  0xe5   :  { %384 = verf.f32 %v118_v38 }
  0xee   :  { %v383_v39 = vpop.eup %382 }
  0xef   :  { %v385_v40 = vpop.eup %384  ;;  %v123_v41 = vadd.f32 1.0, %v383_v39 }
  0xf0   :  { %v122_v43 = vadd.f32 1.0, %v385_v40 }
  0xf1   :  { %v125_v46 = vmul.f32 %v123_v41, %v117_v44 }
  0xf2   :  { %v124_v45 = vmul.f32 %v122_v43, %v116_v42 }
  0xf4   :  { %336 = vmatprep.mubr.f32.mxu1 %v124_v45 }
  0xf5   :  { %337 = vmatmul.mubr.f32.vlgmr.msra.gmra.mrb[0].mxu1 %v125_v46 }
 0x1c8   :  { %v338_v47 = vpop.f32.mrb[0].mxu1 }
 0x1c9   :  { %222 = vst.msk [vmem:[#allocation2 + $0x8] sm:$0xff] %vm34_vm0, %v338_v47  ;;  %v208_v48 = vpop.f32.mrb[1].mxu1 }
 0x1ca   :  { %221 = vst.msk [vmem:[#allocation2] sm:$0xff] %vm34_vm0, %v208_v48 }
 0x1d0   :  { %v237_v50 = vld [vmem:[#allocation2 + $0x8] sm:$0xff] }
 0x1d1   :  { %v236_v51 = vld [vmem:[#allocation2] sm:$0xff]  ;;  %v246_v52 = vadd.f32 %v268_v49, %v237_v50 }
 0x1d2   :  { %v245_v53 = vadd.f32 %v268_v49, %v236_v51 }
 0x1d3   :  { %248 = vst.msk [vmem:[#allocation3 + $0x8] sm:$0xff] %vm34_vm0, %v246_v52 }
 0x1d4   :  { %247 = vst.msk [vmem:[#allocation3] sm:$0xff] %vm34_vm0, %v245_v53 }
 0x1d5   :  { %397 = shalt.err (!%p394_p4)
}
 0x1d6   :  { %s398_s15 = scalar_lea.hbm %s538_s5, 256 }
 0x1d7   :  { %p399_p5 = scmp.ne.s32.totalorder %s538_s5, %s398_s15  ;;  %p402_p6 = scmp.lt.u32.totalorder %s398_s15, %s538_s5 }
 0x1d9   :  { %p404_p7 = pnand %p402_p6, %p399_p5 }
 0x1db   :  { %407 = shalt.err (!%p404_p7)
}
 0x1dc   :  { %s411_s20 = smov 128   ;;  %s412_s21 = smov 8  }
 0x1dd   :  { %260 = dma.vmem_to_hbm [thread:$0]  %s255_s12, 256, %s538_s5, [#allocation4], %s411_s20, %s411_s20, %s412_s21  }
 0x1de   :  { %408 = dma.done.wait [#allocation4], 256  }
 0x1df   :  { %409 = vsyncadd [#allocation4], 4294967040 }
 0x1e0   :  { %264 = vsyncpa [#allocation4], 1 }

</bundles_post_ra>
